<compile_context>
chip_gen: v6e
topology: v6e:2x2x1
jax: 0.10.0
libtpu: 0.0.40
codegen_flags: <defaults>
</compile_context>

<pallas_src>
import math

import jax
import jax.numpy as jnp
from jax.experimental import pallas as pl
from jax.experimental.pallas import tpu as pltpu


def _round_up(n, m):
    return ((n + m - 1) // m) * m


# ----------------------------------------------------------------------------
# Fused Pallas kernel: all TemporalBlocks for one (batch element, time tile)
# ----------------------------------------------------------------------------
def _make_tcn_kernel(cfgs, t_tile):
    n_w = sum(6 if c["has_ds"] else 4 for c in cfgs)

    def kernel(*refs):
        x_ref = refs[0]
        w_refs = refs[1:1 + n_w]
        out_ref = refs[1 + n_w]
        carry_refs = refs[2 + n_w:]          # 2 per layer (conv1, conv2)

        # split the flat weight-ref list per layer
        layer_w, i = [], 0
        for cfg in cfgs:
            n = 6 if cfg["has_ds"] else 4
            layer_w.append(w_refs[i:i + n])
            i += n

        # Zero every causal carry at the first time tile of each batch element.
        @pl.when(pl.program_id(1) == 0)
        def _():
            for c_ref in carry_refs:
                c_ref[...] = jnp.zeros_like(c_ref)

        def causal_conv(a_bf, carry_ref, w_ref, b_ref, k, d):
            """Dilated causal conv on one time tile as a single MXU matmul.

            a_bf      : (C, t_tile) bf16 activation tile
            carry_ref : (C, (K-1)*d) bf16 tail of the previous tiles' input
            w_ref     : (C_out, K*C) bf16, column j*C + i holds torch w[o, i, j]
            b_ref     : (C_out, 1) f32
            """
            pad = (k - 1) * d
            if pad > 0:
                padded = jnp.concatenate([carry_ref[...], a_bf], axis=1)
                # tail of (carry ++ tile) becomes the carry for the next step
                carry_ref[...] = padded[:, t_tile:]
            else:
                padded = a_bf
            if k == 1:
                xs = padded[:, :t_tile]
            else:
                xs = jnp.concatenate(
                    [padded[:, j * d:j * d + t_tile] for j in range(k)], axis=0)
            acc = jnp.dot(w_ref[...], xs, preferred_element_type=jnp.float32)
            return acc + b_ref[...]

        cur = x_ref[0]                                   # (C_in, t_tile) f32
        for li, (cfg, wr) in enumerate(zip(cfgs, layer_w)):
            k, d = cfg["k"], cfg["d"]
            if cfg["has_ds"]:
                w1, b1, w2, b2, wd, bd = wr
            else:
                w1, b1, w2, b2 = wr
            cur_bf = cur.astype(jnp.bfloat16)            # single cast, reused
            h = jnp.maximum(
                causal_conv(cur_bf, carry_refs[2 * li], w1, b1, k, d), 0.0)
            # Dropout2d == identity in eval mode.
            o = jnp.maximum(
                causal_conv(h.astype(jnp.bfloat16), carry_refs[2 * li + 1],
                            w2, b2, k, d), 0.0)
            if cfg["has_ds"]:
                res = jnp.dot(wd[...], cur_bf,
                              preferred_element_type=jnp.float32) + bd[...]
            else:
                res = cur                                # identity residual
            cur = jnp.maximum(o + res, 0.0)
        out_ref[0] = cur

    return kernel


# ----------------------------------------------------------------------------
# VMEM budget (advisory; clamped so it is valid on v5e/v6e/v7x)
# ----------------------------------------------------------------------------
def _estimate_vmem_bytes(cfgs, c_in0, t_tile, weight_bytes):
    c_last = cfgs[-1]["c_out"]
    io = 2 * (c_in0 + c_last) * t_tile * 4               # f32 in/out blocks, 2x buf
    transient = 0
    for cfg in cfgs:
        ci, co, k, d = cfg["c_in"], cfg["c_out"], cfg["k"], cfg["d"]
        pad = (k - 1) * d
        t = (max(ci, co) * (pad + t_tile) * 2             # padded bf16 buffer
             + k * max(ci, co) * t_tile * 2               # bf16 tap slab
             + (ci + 3 * co) * t_tile * 4)                # live f32 activations
        transient = max(transient, t)
    carries = sum((c["c_in"] + c["c_out"]) * max((c["k"] - 1) * c["d"], 1) * 2
                  for c in cfgs)
    total = 2 * weight_bytes + io + transient + carries
    return max(min(int(1.5 * total) + (4 << 20), 64 << 20), 32 << 20)


# ----------------------------------------------------------------------------
# Wrapper (single pallas_call for the whole network)
# ----------------------------------------------------------------------------
def tcn_forward(x, kparams, t_tile_max=512):
    """x: (B, C_in, T) float32 (NCW, as nn.Conv1d expects) -> (B, C_last, T)."""
    B, C_in, T = x.shape
    cfgs = kparams["cfgs"]
    C_last = cfgs[-1]["c_out"]

    # lane-dense time axis: pad to a multiple of 128, pick a tile, pad again
    # so the tile divides T.  Right zero-padding is causal-safe.
    T_pad = _round_up(T, 128)
    t_tile = min(T_pad, max(128, _round_up(t_tile_max, 128)))
    T_pad = _round_up(T_pad, t_tile)
    if T_pad != T:
        x = jnp.pad(x, ((0, 0), (0, 0), (0, T_pad - T)))
    n_t = T_pad // t_tile

    kernel = _make_tcn_kernel(cfgs, t_tile)

    flat_args = [x]
    in_specs = [pl.BlockSpec((1, C_in, t_tile), lambda b, t: (b, 0, t))]
    weight_bytes = 0
    for arrs in kparams["weights"]:
        for arr in arrs:                     # all weight arrays are 2-D
            flat_args.append(arr)
            # constant index map -> weight block stays resident in VMEM
            in_specs.append(pl.BlockSpec(arr.shape, lambda b, t: (0, 0)))
            weight_bytes += arr.size * arr.dtype.itemsize

    # causal carries: 2 per layer, bf16, width (K-1)*dilation
    scratch_shapes = []
    for cfg in cfgs:
        pad = max((cfg["k"] - 1) * cfg["d"], 1)
        scratch_shapes.append(pltpu.VMEM((cfg["c_in"], pad), jnp.bfloat16))
        scratch_shapes.append(pltpu.VMEM((cfg["c_out"], pad), jnp.bfloat16))

    flops = 0
    for cfg in cfgs:
        ci, co, k = cfg["c_in"], cfg["c_out"], cfg["k"]
        flops += 2 * (co * k * ci + co * k * co)
        if cfg["has_ds"]:
            flops += 2 * co * ci
    flops *= B * T_pad
    bytes_accessed = int(x.size * 4 + B * C_last * T_pad * 4 + weight_bytes)

    out = pl.pallas_call(
        kernel,
        out_shape=jax.ShapeDtypeStruct((B, C_last, T_pad), jnp.float32),
        grid=(B, n_t),
        in_specs=in_specs,
        out_specs=pl.BlockSpec((1, C_last, t_tile), lambda b, t: (b, 0, t)),
        scratch_shapes=scratch_shapes,
        compiler_params=pltpu.CompilerParams(
            # batch parallel (megacore split on v7x), time sequential (carry)
            dimension_semantics=("parallel", "arbitrary"),
            vmem_limit_bytes=_estimate_vmem_bytes(cfgs, C_in, t_tile,
                                                  weight_bytes)),
        cost_estimate=pl.CostEstimate(flops=int(flops), transcendentals=0,
                                      bytes_accessed=bytes_accessed),
    )(*flat_args)
    return out[:, :, :T] if T_pad != T else out


# ----------------------------------------------------------------------------
# One-time weight preparation (hoisted out of the forward path)
# ----------------------------------------------------------------------------
def prepare_kernel_params(params):
    cfgs, weights = [], []
    for blk in params["blocks"]:
        c_in, c_out = blk["in_c"], blk["out_c"]
        k, d = blk["kernel_size"], blk["dilation"]
        has_ds = blk["wd"] is not None
        # (C_out, C_in, K) -> (C_out, K, C_in) -> (C_out, K*C_in), bf16
        w1 = jnp.transpose(blk["w1"], (0, 2, 1)).reshape(c_out, k * c_in)
        w2 = jnp.transpose(blk["w2"], (0, 2, 1)).reshape(c_out, k * c_out)
        arrs = [w1.astype(jnp.bfloat16),
                blk["b1"].reshape(c_out, 1).astype(jnp.float32),
                w2.astype(jnp.bfloat16),
                blk["b2"].reshape(c_out, 1).astype(jnp.float32)]
        if has_ds:
            arrs += [blk["wd"].astype(jnp.bfloat16),
                     blk["bd"].reshape(c_out, 1).astype(jnp.float32)]
        cfgs.append(dict(c_in=c_in, c_out=c_out, k=k, d=d, has_ds=has_ds))
        weights.append(arrs)
    return dict(cfgs=cfgs, weights=weights)


# ----------------------------------------------------------------------------
# Pure-JAX references (PyTorch semantics; optional bf16-operand emulation)
# ----------------------------------------------------------------------------
def _conv1d_causal_ref(x, w, b, dilation, pad):
    y = jax.lax.conv_general_dilated(
        x, w, window_strides=(1,), padding=[(pad, pad)],
        rhs_dilation=(dilation,), dimension_numbers=("NCH", "OIH", "NCH"))
    if pad > 0:
        y = y[:, :, :-pad]
    return y + b[None, :, None]


def tcn_forward_ref(x, params, emulate_bf16=False):
    def rnd(a):
        return a.astype(jnp.bfloat16).astype(jnp.float32) if emulate_bf16 else a

    h = x
    for blk in params["blocks"]:
        o = jnp.maximum(_conv1d_causal_ref(rnd(h), rnd(blk["w1"]), blk["b1"],
                                           blk["dilation"], blk["pad"]), 0.0)
        o = jnp.maximum(_conv1d_causal_ref(rnd(o), rnd(blk["w2"]), blk["b2"],
                                           blk["dilation"], blk["pad"]), 0.0)
        if blk["wd"] is not None:
            res = jnp.einsum("oc,bct->bot", rnd(blk["wd"]), rnd(h)) \
                + blk["bd"][None, :, None]
        else:
            res = h
        h = jnp.maximum(o + res, 0.0)
    return h


# ----------------------------------------------------------------------------
# Deterministic parameter init (mirrors the module's __init__ shapes)
# ----------------------------------------------------------------------------
def init_params(key, num_inputs, channels, kernel_size):
    blocks = []
    in_c = num_inputs
    for i, layer in enumerate(channels):
        assert layer[0] == "c", "only classical ('c') Conv1d blocks supported"
        out_c = int(layer[1:])
        d = 2 ** i
        pad = (kernel_size - 1) * d
        key, k1, k2, k3, k4, k5, k6 = jax.random.split(key, 7)
        b1r = 1.0 / math.sqrt(in_c * kernel_size)
        w1 = jax.random.uniform(k1, (out_c, in_c, kernel_size), jnp.float32, -b1r, b1r)
        b1 = jax.random.uniform(k2, (out_c,), jnp.float32, -b1r, b1r)
        b2r = 1.0 / math.sqrt(out_c * kernel_size)
        w2 = jax.random.uniform(k3, (out_c, out_c, kernel_size), jnp.float32, -b2r, b2r)
        b2 = jax.random.uniform(k4, (out_c,), jnp.float32, -b2r, b2r)
        if in_c != out_c:
            bdr = 1.0 / math.sqrt(in_c)
            wd = jax.random.uniform(k5, (out_c, in_c), jnp.float32, -bdr, bdr)
            bd = jax.random.uniform(k6, (out_c,), jnp.float32, -bdr, bdr)
        else:
            wd, bd = None, None                     # identity residual
        blocks.append(dict(w1=w1, b1=b1, w2=w2, b2=b2, wd=wd, bd=bd,
                           dilation=d, pad=pad, kernel_size=kernel_size,
                           in_c=in_c, out_c=out_c))
        in_c = out_c
    return dict(blocks=blocks)


# ----------------------------------------------------------------------------
if __name__ == "__main__":
    key = jax.random.PRNGKey(0)
    B = 2
    input_size = 4
    channels = ["c8", "c8", "c16"]    # covers downsample + identity residuals
    kernel_size = 3

    key, kp, kx1, kx2 = jax.random.split(key, 4)
    params = init_params(kp, input_size, channels, kernel_size)
    kparams = prepare_kernel_params(params)   # weight re-layout done ONCE

    # --- test 1: short sequence (single lane-padded time tile) -------------
    T1 = 16
    x1 = jax.random.normal(kx1, (B, input_size, T1), jnp.float32)   # NCW input
    out1 = tcn_forward(x1, kparams)
    jax.block_until_ready(out1)
    ref1_bf = tcn_forward_ref(x1, params, emulate_bf16=True)  # kernel numerics
    ref1_f32 = tcn_forward_ref(x1, params)                    # PyTorch f32
    assert out1.shape == (B, 16, T1), out1.shape
    assert jnp.allclose(out1, ref1_bf, rtol=1e-2, atol=1e-2), \
        float(jnp.max(jnp.abs(out1 - ref1_bf)))
    assert jnp.allclose(out1, ref1_f32, rtol=1e-1, atol=1e-1), \
        float(jnp.max(jnp.abs(out1 - ref1_f32)))

    # --- test 2: longer sequence -> multiple time tiles (carry path) -------
    T2 = 200
    x2 = jax.random.normal(kx2, (B, input_size, T2), jnp.float32)
    out2 = tcn_forward(x2, kparams, t_tile_max=128)   # 2 tiles of 128 lanes
    jax.block_until_ready(out2)
    ref2_bf = tcn_forward_ref(x2, params, emulate_bf16=True)
    assert out2.shape == (B, 16, T2), out2.shape
    assert jnp.allclose(out2, ref2_bf, rtol=1e-2, atol=1e-2), \
        float(jnp.max(jnp.abs(out2 - ref2_bf)))

    print("KERNEL_OK")
</pallas_src>

<mosaic_0001>
module attributes {stable_mosaic.version = 11 : i64} {
  func.func @kernel(%arg0: i32, %arg1: i32, %arg2: memref<1x4x128xf32, #tpu.memory_space<vmem>>, %arg3: memref<8x12xbf16, #tpu.memory_space<vmem>>, %arg4: memref<8x1xf32, #tpu.memory_space<vmem>>, %arg5: memref<8x24xbf16, #tpu.memory_space<vmem>>, %arg6: memref<8x1xf32, #tpu.memory_space<vmem>>, %arg7: memref<8x4xbf16, #tpu.memory_space<vmem>>, %arg8: memref<8x1xf32, #tpu.memory_space<vmem>>, %arg9: memref<8x24xbf16, #tpu.memory_space<vmem>>, %arg10: memref<8x1xf32, #tpu.memory_space<vmem>>, %arg11: memref<8x24xbf16, #tpu.memory_space<vmem>>, %arg12: memref<8x1xf32, #tpu.memory_space<vmem>>, %arg13: memref<16x24xbf16, #tpu.memory_space<vmem>>, %arg14: memref<16x1xf32, #tpu.memory_space<vmem>>, %arg15: memref<16x48xbf16, #tpu.memory_space<vmem>>, %arg16: memref<16x1xf32, #tpu.memory_space<vmem>>, %arg17: memref<16x8xbf16, #tpu.memory_space<vmem>>, %arg18: memref<16x1xf32, #tpu.memory_space<vmem>>, %arg19: memref<1x16x128xf32, #tpu.memory_space<vmem>>, %arg20: memref<4x2xbf16, #tpu.memory_space<vmem>>, %arg21: memref<8x2xbf16, #tpu.memory_space<vmem>>, %arg22: memref<8x4xbf16, #tpu.memory_space<vmem>>, %arg23: memref<8x4xbf16, #tpu.memory_space<vmem>>, %arg24: memref<8x8xbf16, #tpu.memory_space<vmem>>, %arg25: memref<16x8xbf16, #tpu.memory_space<vmem>>) attributes {dimension_semantics = [#tpu.dimension_semantics<parallel>, #tpu.dimension_semantics<arbitrary>], iteration_bounds = array<i64: 2, 1>, scalar_prefetch = 0 : i64, scratch_operands = 6 : i64, tpu.core_type = #tpu.core_type<tc>, window_params = [{transform_indices = @transform_0, window_bounds = array<i64: 1, 4, 128>}, {pipeline_mode = #tpu.pipeline_mode<synchronous>, transform_indices = @transform_1, window_bounds = array<i64: 8, 12>}, {pipeline_mode = #tpu.pipeline_mode<synchronous>, transform_indices = @transform_2, window_bounds = array<i64: 8, 1>}, {pipeline_mode = #tpu.pipeline_mode<synchronous>, transform_indices = @transform_3, window_bounds = array<i64: 8, 24>}, {pipeline_mode = #tpu.pipeline_mode<synchronous>, transform_indices = @transform_4, window_bounds = array<i64: 8, 1>}, {pipeline_mode = #tpu.pipeline_mode<synchronous>, transform_indices = @transform_5, window_bounds = array<i64: 8, 4>}, {pipeline_mode = #tpu.pipeline_mode<synchronous>, transform_indices = @transform_6, window_bounds = array<i64: 8, 1>}, {pipeline_mode = #tpu.pipeline_mode<synchronous>, transform_indices = @transform_7, window_bounds = array<i64: 8, 24>}, {pipeline_mode = #tpu.pipeline_mode<synchronous>, transform_indices = @transform_8, window_bounds = array<i64: 8, 1>}, {pipeline_mode = #tpu.pipeline_mode<synchronous>, transform_indices = @transform_9, window_bounds = array<i64: 8, 24>}, {pipeline_mode = #tpu.pipeline_mode<synchronous>, transform_indices = @transform_10, window_bounds = array<i64: 8, 1>}, {pipeline_mode = #tpu.pipeline_mode<synchronous>, transform_indices = @transform_11, window_bounds = array<i64: 16, 24>}, {pipeline_mode = #tpu.pipeline_mode<synchronous>, transform_indices = @transform_12, window_bounds = array<i64: 16, 1>}, {pipeline_mode = #tpu.pipeline_mode<synchronous>, transform_indices = @transform_13, window_bounds = array<i64: 16, 48>}, {pipeline_mode = #tpu.pipeline_mode<synchronous>, transform_indices = @transform_14, window_bounds = array<i64: 16, 1>}, {pipeline_mode = #tpu.pipeline_mode<synchronous>, transform_indices = @transform_15, window_bounds = array<i64: 16, 8>}, {pipeline_mode = #tpu.pipeline_mode<synchronous>, transform_indices = @transform_16, window_bounds = array<i64: 16, 1>}, {transform_indices = @transform_17, window_bounds = array<i64: 1, 16, 128>}]} {
    %c0_i32 = arith.constant 0 : i32
    %0 = arith.cmpi eq, %arg1, %c0_i32 : i32
    %1 = arith.extui %0 : i1 to i32
    %c0_i32_0 = arith.constant 0 : i32
    %2 = arith.cmpi ne, %1, %c0_i32_0 : i32
    scf.if %2 {
      %cst_78 = arith.constant 0.000000e+00 : bf16
      %123 = vector.broadcast %cst_78 : bf16 to vector<4x2xbf16>
      %c0_79 = arith.constant 0 : index
      %c0_80 = arith.constant 0 : index
      %124 = vector.load %arg20[%c0_79, %c0_80] : memref<4x2xbf16, #tpu.memory_space<vmem>>, vector<4x2xbf16>
      tpu.vector_store %arg20[%c0_79, %c0_80], %123 {strides = array<i32>} : memref<4x2xbf16, #tpu.memory_space<vmem>>, vector<4x2xbf16>,
      %cst_81 = arith.constant 0.000000e+00 : bf16
      %125 = vector.broadcast %cst_81 : bf16 to vector<8x2xbf16>
      %c0_82 = arith.constant 0 : index
      %c0_83 = arith.constant 0 : index
      %126 = vector.load %arg21[%c0_82, %c0_83] : memref<8x2xbf16, #tpu.memory_space<vmem>>, vector<8x2xbf16>
      tpu.vector_store %arg21[%c0_82, %c0_83], %125 {strides = array<i32>} : memref<8x2xbf16, #tpu.memory_space<vmem>>, vector<8x2xbf16>,
      %cst_84 = arith.constant 0.000000e+00 : bf16
      %127 = vector.broadcast %cst_84 : bf16 to vector<8x4xbf16>
      %c0_85 = arith.constant 0 : index
      %c0_86 = arith.constant 0 : index
      %128 = vector.load %arg22[%c0_85, %c0_86] : memref<8x4xbf16, #tpu.memory_space<vmem>>, vector<8x4xbf16>
      tpu.vector_store %arg22[%c0_85, %c0_86], %127 {strides = array<i32>} : memref<8x4xbf16, #tpu.memory_space<vmem>>, vector<8x4xbf16>,
      %cst_87 = arith.constant 0.000000e+00 : bf16
      %129 = vector.broadcast %cst_87 : bf16 to vector<8x4xbf16>
      %c0_88 = arith.constant 0 : index
      %c0_89 = arith.constant 0 : index
      %130 = vector.load %arg23[%c0_88, %c0_89] : memref<8x4xbf16, #tpu.memory_space<vmem>>, vector<8x4xbf16>
      tpu.vector_store %arg23[%c0_88, %c0_89], %129 {strides = array<i32>} : memref<8x4xbf16, #tpu.memory_space<vmem>>, vector<8x4xbf16>,
      %cst_90 = arith.constant 0.000000e+00 : bf16
      %131 = vector.broadcast %cst_90 : bf16 to vector<8x8xbf16>
      %c0_91 = arith.constant 0 : index
      %c0_92 = arith.constant 0 : index
      %132 = vector.load %arg24[%c0_91, %c0_92] : memref<8x8xbf16, #tpu.memory_space<vmem>>, vector<8x8xbf16>
      tpu.vector_store %arg24[%c0_91, %c0_92], %131 {strides = array<i32>} : memref<8x8xbf16, #tpu.memory_space<vmem>>, vector<8x8xbf16>,
      %cst_93 = arith.constant 0.000000e+00 : bf16
      %133 = vector.broadcast %cst_93 : bf16 to vector<16x8xbf16>
      %c0_94 = arith.constant 0 : index
      %c0_95 = arith.constant 0 : index
      %134 = vector.load %arg25[%c0_94, %c0_95] : memref<16x8xbf16, #tpu.memory_space<vmem>>, vector<16x8xbf16>
      tpu.vector_store %arg25[%c0_94, %c0_95], %133 {strides = array<i32>} : memref<16x8xbf16, #tpu.memory_space<vmem>>, vector<16x8xbf16>,
    } else {
    }
    %c0 = arith.constant 0 : index
    %c0_1 = arith.constant 0 : index
    %c0_2 = arith.constant 0 : index
    %3 = vector.load %arg2[%c0, %c0_1, %c0_2] : memref<1x4x128xf32, #tpu.memory_space<vmem>>, vector<1x4x128xf32>
    %4 = vector.shape_cast %3 : vector<1x4x128xf32> to vector<4x128xf32>
    %5 = arith.truncf %4 : vector<4x128xf32> to vector<4x128xbf16>
    %c0_3 = arith.constant 0 : index
    %c0_4 = arith.constant 0 : index
    %6 = vector.load %arg20[%c0_3, %c0_4] : memref<4x2xbf16, #tpu.memory_space<vmem>>, vector<4x2xbf16>
    %7 = tpu.concatenate %6, %5 in 1 : vector<4x2xbf16>, vector<4x128xbf16> -> vector<4x130xbf16>
    %8 = vector.extract_strided_slice %7 {offsets = [0, 128], sizes = [4, 2], strides = [1, 1]} : vector<4x130xbf16> to vector<4x2xbf16>
    %c0_5 = arith.constant 0 : index
    %c0_6 = arith.constant 0 : index
    %9 = vector.load %arg20[%c0_5, %c0_6] : memref<4x2xbf16, #tpu.memory_space<vmem>>, vector<4x2xbf16>
    tpu.vector_store %arg20[%c0_5, %c0_6], %8 {strides = array<i32>} : memref<4x2xbf16, #tpu.memory_space<vmem>>, vector<4x2xbf16>,
    %10 = vector.extract_strided_slice %7 {offsets = [0, 0], sizes = [4, 128], strides = [1, 1]} : vector<4x130xbf16> to vector<4x128xbf16>
    %11 = vector.extract_strided_slice %7 {offsets = [0, 1], sizes = [4, 128], strides = [1, 1]} : vector<4x130xbf16> to vector<4x128xbf16>
    %12 = vector.extract_strided_slice %7 {offsets = [0, 2], sizes = [4, 128], strides = [1, 1]} : vector<4x130xbf16> to vector<4x128xbf16>
    %13 = tpu.concatenate %10, %11, %12 in 0 : vector<4x128xbf16>, vector<4x128xbf16>, vector<4x128xbf16> -> vector<12x128xbf16>
    %c0_7 = arith.constant 0 : index
    %c0_8 = arith.constant 0 : index
    %14 = vector.load %arg3[%c0_7, %c0_8] : memref<8x12xbf16, #tpu.memory_space<vmem>>, vector<8x12xbf16>
    %cst = arith.constant dense<0.000000e+00> : vector<8x128xf32>
    %15 = tpu.matmul %14, %13, %cst {dimension_numbers = #tpu.dot_dimension_numbers<[1], [0], [0], [1], [0, 0, 1, 1], [], []>} : vector<8x12xbf16>, vector<12x128xbf16>, vector<8x128xf32> -> vector<8x128xf32>
    %c0_9 = arith.constant 0 : index
    %c0_10 = arith.constant 0 : index
    %16 = vector.load %arg4[%c0_9, %c0_10] : memref<8x1xf32, #tpu.memory_space<vmem>>, vector<8x1xf32>
    %17 = vector.broadcast %16 : vector<8x1xf32> to vector<8x128xf32>
    %18 = arith.addf %15, %17 : vector<8x128xf32>
    %cst_11 = arith.constant 0.000000e+00 : f32
    %19 = vector.broadcast %cst_11 : f32 to vector<8x128xf32>
    %20 = arith.maximumf %18, %19 : vector<8x128xf32>
    %21 = arith.truncf %20 : vector<8x128xf32> to vector<8x128xbf16>
    %c0_12 = arith.constant 0 : index
    %c0_13 = arith.constant 0 : index
    %22 = vector.load %arg21[%c0_12, %c0_13] : memref<8x2xbf16, #tpu.memory_space<vmem>>, vector<8x2xbf16>
    %23 = tpu.concatenate %22, %21 in 1 : vector<8x2xbf16>, vector<8x128xbf16> -> vector<8x130xbf16>
    %24 = vector.extract_strided_slice %23 {offsets = [0, 128], sizes = [8, 2], strides = [1, 1]} : vector<8x130xbf16> to vector<8x2xbf16>
    %c0_14 = arith.constant 0 : index
    %c0_15 = arith.constant 0 : index
    %25 = vector.load %arg21[%c0_14, %c0_15] : memref<8x2xbf16, #tpu.memory_space<vmem>>, vector<8x2xbf16>
    tpu.vector_store %arg21[%c0_14, %c0_15], %24 {strides = array<i32>} : memref<8x2xbf16, #tpu.memory_space<vmem>>, vector<8x2xbf16>,
    %26 = vector.extract_strided_slice %23 {offsets = [0, 0], sizes = [8, 128], strides = [1, 1]} : vector<8x130xbf16> to vector<8x128xbf16>
    %27 = vector.extract_strided_slice %23 {offsets = [0, 1], sizes = [8, 128], strides = [1, 1]} : vector<8x130xbf16> to vector<8x128xbf16>
    %28 = vector.extract_strided_slice %23 {offsets = [0, 2], sizes = [8, 128], strides = [1, 1]} : vector<8x130xbf16> to vector<8x128xbf16>
    %29 = tpu.concatenate %26, %27, %28 in 0 : vector<8x128xbf16>, vector<8x128xbf16>, vector<8x128xbf16> -> vector<24x128xbf16>
    %c0_16 = arith.constant 0 : index
    %c0_17 = arith.constant 0 : index
    %30 = vector.load %arg5[%c0_16, %c0_17] : memref<8x24xbf16, #tpu.memory_space<vmem>>, vector<8x24xbf16>
    %cst_18 = arith.constant dense<0.000000e+00> : vector<8x128xf32>
    %31 = tpu.matmul %30, %29, %cst_18 {dimension_numbers = #tpu.dot_dimension_numbers<[1], [0], [0], [1], [0, 0, 1, 1], [], []>} : vector<8x24xbf16>, vector<24x128xbf16>, vector<8x128xf32> -> vector<8x128xf32>
    %c0_19 = arith.constant 0 : index
    %c0_20 = arith.constant 0 : index
    %32 = vector.load %arg6[%c0_19, %c0_20] : memref<8x1xf32, #tpu.memory_space<vmem>>, vector<8x1xf32>
    %33 = vector.broadcast %32 : vector<8x1xf32> to vector<8x128xf32>
    %34 = arith.addf %31, %33 : vector<8x128xf32>
    %cst_21 = arith.constant 0.000000e+00 : f32
    %35 = vector.broadcast %cst_21 : f32 to vector<8x128xf32>
    %36 = arith.maximumf %34, %35 : vector<8x128xf32>
    %c0_22 = arith.constant 0 : index
    %c0_23 = arith.constant 0 : index
    %37 = vector.load %arg7[%c0_22, %c0_23] : memref<8x4xbf16, #tpu.memory_space<vmem>>, vector<8x4xbf16>
    %cst_24 = arith.constant dense<0.000000e+00> : vector<8x128xf32>
    %38 = tpu.matmul %37, %5, %cst_24 {dimension_numbers = #tpu.dot_dimension_numbers<[1], [0], [0], [1], [0, 0, 1, 1], [], []>} : vector<8x4xbf16>, vector<4x128xbf16>, vector<8x128xf32> -> vector<8x128xf32>
    %c0_25 = arith.constant 0 : index
    %c0_26 = arith.constant 0 : index
    %39 = vector.load %arg8[%c0_25, %c0_26] : memref<8x1xf32, #tpu.memory_space<vmem>>, vector<8x1xf32>
    %40 = vector.broadcast %39 : vector<8x1xf32> to vector<8x128xf32>
    %41 = arith.addf %38, %40 : vector<8x128xf32>
    %42 = arith.addf %36, %41 : vector<8x128xf32>
    %cst_27 = arith.constant 0.000000e+00 : f32
    %43 = vector.broadcast %cst_27 : f32 to vector<8x128xf32>
    %44 = arith.maximumf %42, %43 : vector<8x128xf32>
    %45 = arith.truncf %44 : vector<8x128xf32> to vector<8x128xbf16>
    %c0_28 = arith.constant 0 : index
    %c0_29 = arith.constant 0 : index
    %46 = vector.load %arg22[%c0_28, %c0_29] : memref<8x4xbf16, #tpu.memory_space<vmem>>, vector<8x4xbf16>
    %47 = tpu.concatenate %46, %45 in 1 : vector<8x4xbf16>, vector<8x128xbf16> -> vector<8x132xbf16>
    %48 = vector.extract_strided_slice %47 {offsets = [0, 128], sizes = [8, 4], strides = [1, 1]} : vector<8x132xbf16> to vector<8x4xbf16>
    %c0_30 = arith.constant 0 : index
    %c0_31 = arith.constant 0 : index
    %49 = vector.load %arg22[%c0_30, %c0_31] : memref<8x4xbf16, #tpu.memory_space<vmem>>, vector<8x4xbf16>
    tpu.vector_store %arg22[%c0_30, %c0_31], %48 {strides = array<i32>} : memref<8x4xbf16, #tpu.memory_space<vmem>>, vector<8x4xbf16>,
    %50 = vector.extract_strided_slice %47 {offsets = [0, 0], sizes = [8, 128], strides = [1, 1]} : vector<8x132xbf16> to vector<8x128xbf16>
    %51 = vector.extract_strided_slice %47 {offsets = [0, 2], sizes = [8, 128], strides = [1, 1]} : vector<8x132xbf16> to vector<8x128xbf16>
    %52 = vector.extract_strided_slice %47 {offsets = [0, 4], sizes = [8, 128], strides = [1, 1]} : vector<8x132xbf16> to vector<8x128xbf16>
    %53 = tpu.concatenate %50, %51, %52 in 0 : vector<8x128xbf16>, vector<8x128xbf16>, vector<8x128xbf16> -> vector<24x128xbf16>
    %c0_32 = arith.constant 0 : index
    %c0_33 = arith.constant 0 : index
    %54 = vector.load %arg9[%c0_32, %c0_33] : memref<8x24xbf16, #tpu.memory_space<vmem>>, vector<8x24xbf16>
    %cst_34 = arith.constant dense<0.000000e+00> : vector<8x128xf32>
    %55 = tpu.matmul %54, %53, %cst_34 {dimension_numbers = #tpu.dot_dimension_numbers<[1], [0], [0], [1], [0, 0, 1, 1], [], []>} : vector<8x24xbf16>, vector<24x128xbf16>, vector<8x128xf32> -> vector<8x128xf32>
    %c0_35 = arith.constant 0 : index
    %c0_36 = arith.constant 0 : index
    %56 = vector.load %arg10[%c0_35, %c0_36] : memref<8x1xf32, #tpu.memory_space<vmem>>, vector<8x1xf32>
    %57 = vector.broadcast %56 : vector<8x1xf32> to vector<8x128xf32>
    %58 = arith.addf %55, %57 : vector<8x128xf32>
    %cst_37 = arith.constant 0.000000e+00 : f32
    %59 = vector.broadcast %cst_37 : f32 to vector<8x128xf32>
    %60 = arith.maximumf %58, %59 : vector<8x128xf32>
    %61 = arith.truncf %60 : vector<8x128xf32> to vector<8x128xbf16>
    %c0_38 = arith.constant 0 : index
    %c0_39 = arith.constant 0 : index
    %62 = vector.load %arg23[%c0_38, %c0_39] : memref<8x4xbf16, #tpu.memory_space<vmem>>, vector<8x4xbf16>
    %63 = tpu.concatenate %62, %61 in 1 : vector<8x4xbf16>, vector<8x128xbf16> -> vector<8x132xbf16>
    %64 = vector.extract_strided_slice %63 {offsets = [0, 128], sizes = [8, 4], strides = [1, 1]} : vector<8x132xbf16> to vector<8x4xbf16>
    %c0_40 = arith.constant 0 : index
    %c0_41 = arith.constant 0 : index
    %65 = vector.load %arg23[%c0_40, %c0_41] : memref<8x4xbf16, #tpu.memory_space<vmem>>, vector<8x4xbf16>
    tpu.vector_store %arg23[%c0_40, %c0_41], %64 {strides = array<i32>} : memref<8x4xbf16, #tpu.memory_space<vmem>>, vector<8x4xbf16>,
    %66 = vector.extract_strided_slice %63 {offsets = [0, 0], sizes = [8, 128], strides = [1, 1]} : vector<8x132xbf16> to vector<8x128xbf16>
    %67 = vector.extract_strided_slice %63 {offsets = [0, 2], sizes = [8, 128], strides = [1, 1]} : vector<8x132xbf16> to vector<8x128xbf16>
    %68 = vector.extract_strided_slice %63 {offsets = [0, 4], sizes = [8, 128], strides = [1, 1]} : vector<8x132xbf16> to vector<8x128xbf16>
    %69 = tpu.concatenate %66, %67, %68 in 0 : vector<8x128xbf16>, vector<8x128xbf16>, vector<8x128xbf16> -> vector<24x128xbf16>
    %c0_42 = arith.constant 0 : index
    %c0_43 = arith.constant 0 : index
    %70 = vector.load %arg11[%c0_42, %c0_43] : memref<8x24xbf16, #tpu.memory_space<vmem>>, vector<8x24xbf16>
    %cst_44 = arith.constant dense<0.000000e+00> : vector<8x128xf32>
    %71 = tpu.matmul %70, %69, %cst_44 {dimension_numbers = #tpu.dot_dimension_numbers<[1], [0], [0], [1], [0, 0, 1, 1], [], []>} : vector<8x24xbf16>, vector<24x128xbf16>, vector<8x128xf32> -> vector<8x128xf32>
    %c0_45 = arith.constant 0 : index
    %c0_46 = arith.constant 0 : index
    %72 = vector.load %arg12[%c0_45, %c0_46] : memref<8x1xf32, #tpu.memory_space<vmem>>, vector<8x1xf32>
    %73 = vector.broadcast %72 : vector<8x1xf32> to vector<8x128xf32>
    %74 = arith.addf %71, %73 : vector<8x128xf32>
    %cst_47 = arith.constant 0.000000e+00 : f32
    %75 = vector.broadcast %cst_47 : f32 to vector<8x128xf32>
    %76 = arith.maximumf %74, %75 : vector<8x128xf32>
    %77 = arith.addf %76, %44 : vector<8x128xf32>
    %cst_48 = arith.constant 0.000000e+00 : f32
    %78 = vector.broadcast %cst_48 : f32 to vector<8x128xf32>
    %79 = arith.maximumf %77, %78 : vector<8x128xf32>
    %80 = arith.truncf %79 : vector<8x128xf32> to vector<8x128xbf16>
    %c0_49 = arith.constant 0 : index
    %c0_50 = arith.constant 0 : index
    %81 = vector.load %arg24[%c0_49, %c0_50] : memref<8x8xbf16, #tpu.memory_space<vmem>>, vector<8x8xbf16>
    %82 = tpu.concatenate %81, %80 in 1 : vector<8x8xbf16>, vector<8x128xbf16> -> vector<8x136xbf16>
    %83 = vector.extract_strided_slice %82 {offsets = [0, 128], sizes = [8, 8], strides = [1, 1]} : vector<8x136xbf16> to vector<8x8xbf16>
    %c0_51 = arith.constant 0 : index
    %c0_52 = arith.constant 0 : index
    %84 = vector.load %arg24[%c0_51, %c0_52] : memref<8x8xbf16, #tpu.memory_space<vmem>>, vector<8x8xbf16>
    tpu.vector_store %arg24[%c0_51, %c0_52], %83 {strides = array<i32>} : memref<8x8xbf16, #tpu.memory_space<vmem>>, vector<8x8xbf16>,
    %85 = vector.extract_strided_slice %82 {offsets = [0, 0], sizes = [8, 128], strides = [1, 1]} : vector<8x136xbf16> to vector<8x128xbf16>
    %86 = vector.extract_strided_slice %82 {offsets = [0, 4], sizes = [8, 128], strides = [1, 1]} : vector<8x136xbf16> to vector<8x128xbf16>
    %87 = vector.extract_strided_slice %82 {offsets = [0, 8], sizes = [8, 128], strides = [1, 1]} : vector<8x136xbf16> to vector<8x128xbf16>
    %88 = tpu.concatenate %85, %86, %87 in 0 : vector<8x128xbf16>, vector<8x128xbf16>, vector<8x128xbf16> -> vector<24x128xbf16>
    %c0_53 = arith.constant 0 : index
    %c0_54 = arith.constant 0 : index
    %89 = vector.load %arg13[%c0_53, %c0_54] : memref<16x24xbf16, #tpu.memory_space<vmem>>, vector<16x24xbf16>
    %cst_55 = arith.constant dense<0.000000e+00> : vector<16x128xf32>
    %90 = tpu.matmul %89, %88, %cst_55 {dimension_numbers = #tpu.dot_dimension_numbers<[1], [0], [0], [1], [0, 0, 1, 1], [], []>} : vector<16x24xbf16>, vector<24x128xbf16>, vector<16x128xf32> -> vector<16x128xf32>
    %c0_56 = arith.constant 0 : index
    %c0_57 = arith.constant 0 : index
    %91 = vector.load %arg14[%c0_56, %c0_57] : memref<16x1xf32, #tpu.memory_space<vmem>>, vector<16x1xf32>
    %92 = vector.broadcast %91 : vector<16x1xf32> to vector<16x128xf32>
    %93 = arith.addf %90, %92 : vector<16x128xf32>
    %cst_58 = arith.constant 0.000000e+00 : f32
    %94 = vector.broadcast %cst_58 : f32 to vector<16x128xf32>
    %95 = arith.maximumf %93, %94 : vector<16x128xf32>
    %96 = arith.truncf %95 : vector<16x128xf32> to vector<16x128xbf16>
    %c0_59 = arith.constant 0 : index
    %c0_60 = arith.constant 0 : index
    %97 = vector.load %arg25[%c0_59, %c0_60] : memref<16x8xbf16, #tpu.memory_space<vmem>>, vector<16x8xbf16>
    %98 = tpu.concatenate %97, %96 in 1 : vector<16x8xbf16>, vector<16x128xbf16> -> vector<16x136xbf16>
    %99 = vector.extract_strided_slice %98 {offsets = [0, 128], sizes = [16, 8], strides = [1, 1]} : vector<16x136xbf16> to vector<16x8xbf16>
    %c0_61 = arith.constant 0 : index
    %c0_62 = arith.constant 0 : index
    %100 = vector.load %arg25[%c0_61, %c0_62] : memref<16x8xbf16, #tpu.memory_space<vmem>>, vector<16x8xbf16>
    tpu.vector_store %arg25[%c0_61, %c0_62], %99 {strides = array<i32>} : memref<16x8xbf16, #tpu.memory_space<vmem>>, vector<16x8xbf16>,
    %101 = vector.extract_strided_slice %98 {offsets = [0, 0], sizes = [16, 128], strides = [1, 1]} : vector<16x136xbf16> to vector<16x128xbf16>
    %102 = vector.extract_strided_slice %98 {offsets = [0, 4], sizes = [16, 128], strides = [1, 1]} : vector<16x136xbf16> to vector<16x128xbf16>
    %103 = vector.extract_strided_slice %98 {offsets = [0, 8], sizes = [16, 128], strides = [1, 1]} : vector<16x136xbf16> to vector<16x128xbf16>
    %104 = tpu.concatenate %101, %102, %103 in 0 : vector<16x128xbf16>, vector<16x128xbf16>, vector<16x128xbf16> -> vector<48x128xbf16>
    %c0_63 = arith.constant 0 : index
    %c0_64 = arith.constant 0 : index
    %105 = vector.load %arg15[%c0_63, %c0_64] : memref<16x48xbf16, #tpu.memory_space<vmem>>, vector<16x48xbf16>
    %cst_65 = arith.constant dense<0.000000e+00> : vector<16x128xf32>
    %106 = tpu.matmul %105, %104, %cst_65 {dimension_numbers = #tpu.dot_dimension_numbers<[1], [0], [0], [1], [0, 0, 1, 1], [], []>} : vector<16x48xbf16>, vector<48x128xbf16>, vector<16x128xf32> -> vector<16x128xf32>
    %c0_66 = arith.constant 0 : index
    %c0_67 = arith.constant 0 : index
    %107 = vector.load %arg16[%c0_66, %c0_67] : memref<16x1xf32, #tpu.memory_space<vmem>>, vector<16x1xf32>
    %108 = vector.broadcast %107 : vector<16x1xf32> to vector<16x128xf32>
    %109 = arith.addf %106, %108 : vector<16x128xf32>
    %cst_68 = arith.constant 0.000000e+00 : f32
    %110 = vector.broadcast %cst_68 : f32 to vector<16x128xf32>
    %111 = arith.maximumf %109, %110 : vector<16x128xf32>
    %c0_69 = arith.constant 0 : index
    %c0_70 = arith.constant 0 : index
    %112 = vector.load %arg17[%c0_69, %c0_70] : memref<16x8xbf16, #tpu.memory_space<vmem>>, vector<16x8xbf16>
    %cst_71 = arith.constant dense<0.000000e+00> : vector<16x128xf32>
    %113 = tpu.matmul %112, %80, %cst_71 {dimension_numbers = #tpu.dot_dimension_numbers<[1], [0], [0], [1], [0, 0, 1, 1], [], []>} : vector<16x8xbf16>, vector<8x128xbf16>, vector<16x128xf32> -> vector<16x128xf32>
    %c0_72 = arith.constant 0 : index
    %c0_73 = arith.constant 0 : index
    %114 = vector.load %arg18[%c0_72, %c0_73] : memref<16x1xf32, #tpu.memory_space<vmem>>, vector<16x1xf32>
    %115 = vector.broadcast %114 : vector<16x1xf32> to vector<16x128xf32>
    %116 = arith.addf %113, %115 : vector<16x128xf32>
    %117 = arith.addf %111, %116 : vector<16x128xf32>
    %cst_74 = arith.constant 0.000000e+00 : f32
    %118 = vector.broadcast %cst_74 : f32 to vector<16x128xf32>
    %119 = arith.maximumf %117, %118 : vector<16x128xf32>
    %c0_75 = arith.constant 0 : index
    %c0_76 = arith.constant 0 : index
    %c0_77 = arith.constant 0 : index
    %120 = vector.load %arg19[%c0_75, %c0_76, %c0_77] : memref<1x16x128xf32, #tpu.memory_space<vmem>>, vector<1x16x128xf32>
    %121 = vector.shape_cast %120 : vector<1x16x128xf32> to vector<16x128xf32>
    %122 = vector.shape_cast %119 : vector<16x128xf32> to vector<1x16x128xf32>
    tpu.vector_store %arg19[%c0_75, %c0_76, %c0_77], %122 {strides = array<i32>} : memref<1x16x128xf32, #tpu.memory_space<vmem>>, vector<1x16x128xf32>,
    return
  }
  func.func @transform_0(%arg0: i32, %arg1: i32) -> (i32, i32, i32) {
    %c0_i32 = arith.constant 0 : i32
    %c0_i32_0 = arith.constant 0 : i32
    return %arg0, %c0_i32, %arg1 : i32, i32, i32
  }
  func.func @transform_1(%arg0: i32, %arg1: i32) -> (i32, i32) {
    %c0_i32 = arith.constant 0 : i32
    %c0_i32_0 = arith.constant 0 : i32
    %c0_i32_1 = arith.constant 0 : i32
    return %c0_i32, %c0_i32_0 : i32, i32
  }
  func.func @transform_2(%arg0: i32, %arg1: i32) -> (i32, i32) {
    %c0_i32 = arith.constant 0 : i32
    %c0_i32_0 = arith.constant 0 : i32
    %c0_i32_1 = arith.constant 0 : i32
    return %c0_i32, %c0_i32_0 : i32, i32
  }
  func.func @transform_3(%arg0: i32, %arg1: i32) -> (i32, i32) {
    %c0_i32 = arith.constant 0 : i32
    %c0_i32_0 = arith.constant 0 : i32
    %c0_i32_1 = arith.constant 0 : i32
    return %c0_i32, %c0_i32_0 : i32, i32
  }
  func.func @transform_4(%arg0: i32, %arg1: i32) -> (i32, i32) {
    %c0_i32 = arith.constant 0 : i32
    %c0_i32_0 = arith.constant 0 : i32
    %c0_i32_1 = arith.constant 0 : i32
    return %c0_i32, %c0_i32_0 : i32, i32
  }
  func.func @transform_5(%arg0: i32, %arg1: i32) -> (i32, i32) {
    %c0_i32 = arith.constant 0 : i32
    %c0_i32_0 = arith.constant 0 : i32
    %c0_i32_1 = arith.constant 0 : i32
    return %c0_i32, %c0_i32_0 : i32, i32
  }
  func.func @transform_6(%arg0: i32, %arg1: i32) -> (i32, i32) {
    %c0_i32 = arith.constant 0 : i32
    %c0_i32_0 = arith.constant 0 : i32
    %c0_i32_1 = arith.constant 0 : i32
    return %c0_i32, %c0_i32_0 : i32, i32
  }
  func.func @transform_7(%arg0: i32, %arg1: i32) -> (i32, i32) {
    %c0_i32 = arith.constant 0 : i32
    %c0_i32_0 = arith.constant 0 : i32
    %c0_i32_1 = arith.constant 0 : i32
    return %c0_i32, %c0_i32_0 : i32, i32
  }
  func.func @transform_8(%arg0: i32, %arg1: i32) -> (i32, i32) {
    %c0_i32 = arith.constant 0 : i32
    %c0_i32_0 = arith.constant 0 : i32
    %c0_i32_1 = arith.constant 0 : i32
    return %c0_i32, %c0_i32_0 : i32, i32
  }
  func.func @transform_9(%arg0: i32, %arg1: i32) -> (i32, i32) {
    %c0_i32 = arith.constant 0 : i32
    %c0_i32_0 = arith.constant 0 : i32
    %c0_i32_1 = arith.constant 0 : i32
    return %c0_i32, %c0_i32_0 : i32, i32
  }
  func.func @transform_10(%arg0: i32, %arg1: i32) -> (i32, i32) {
    %c0_i32 = arith.constant 0 : i32
    %c0_i32_0 = arith.constant 0 : i32
    %c0_i32_1 = arith.constant 0 : i32
    return %c0_i32, %c0_i32_0 : i32, i32
  }
  func.func @transform_11(%arg0: i32, %arg1: i32) -> (i32, i32) {
    %c0_i32 = arith.constant 0 : i32
    %c0_i32_0 = arith.constant 0 : i32
    %c0_i32_1 = arith.constant 0 : i32
    return %c0_i32, %c0_i32_0 : i32, i32
  }
  func.func @transform_12(%arg0: i32, %arg1: i32) -> (i32, i32) {
    %c0_i32 = arith.constant 0 : i32
    %c0_i32_0 = arith.constant 0 : i32
    %c0_i32_1 = arith.constant 0 : i32
    return %c0_i32, %c0_i32_0 : i32, i32
  }
  func.func @transform_13(%arg0: i32, %arg1: i32) -> (i32, i32) {
    %c0_i32 = arith.constant 0 : i32
    %c0_i32_0 = arith.constant 0 : i32
    %c0_i32_1 = arith.constant 0 : i32
    return %c0_i32, %c0_i32_0 : i32, i32
  }
  func.func @transform_14(%arg0: i32, %arg1: i32) -> (i32, i32) {
    %c0_i32 = arith.constant 0 : i32
    %c0_i32_0 = arith.constant 0 : i32
    %c0_i32_1 = arith.constant 0 : i32
    return %c0_i32, %c0_i32_0 : i32, i32
  }
  func.func @transform_15(%arg0: i32, %arg1: i32) -> (i32, i32) {
    %c0_i32 = arith.constant 0 : i32
    %c0_i32_0 = arith.constant 0 : i32
    %c0_i32_1 = arith.constant 0 : i32
    return %c0_i32, %c0_i32_0 : i32, i32
  }
  func.func @transform_16(%arg0: i32, %arg1: i32) -> (i32, i32) {
    %c0_i32 = arith.constant 0 : i32
    %c0_i32_0 = arith.constant 0 : i32
    %c0_i32_1 = arith.constant 0 : i32
    return %c0_i32, %c0_i32_0 : i32, i32
  }
  func.func @transform_17(%arg0: i32, %arg1: i32) -> (i32, i32, i32) {
    %c0_i32 = arith.constant 0 : i32
    %c0_i32_0 = arith.constant 0 : i32
    return %arg0, %c0_i32, %arg1 : i32, i32, i32
  }
}

</mosaic_0001>

<bundles_post_ra>
// kernel: tpu_custom_call.1
= control target key start
LH: loop header
LB: loop body
LE: loop exit
PB: predicated region body
PF: predicated region fallthrough
CT: control target
= control target key end

     0   :  { %s1996_s0 = inlined_call_operand.vmem [shape: f32[2,4,128], index: 0, kind: input, shape index: {}]   ;;  %s1997_s1 = inlined_call_operand.vmem [shape: bf16[8,12], index: 1, kind: input, shape index: {}]   ;;  %s1998_s2 = inlined_call_operand.vmem [shape: f32[8,1], index: 2, kind: input, shape index: {}]   ;;  %s1999_s3 = inlined_call_operand.vmem [shape: bf16[8,24], index: 3, kind: input, shape index: {}]   ;;  %s2000_s4 = inlined_call_operand.vmem [shape: f32[8,1], index: 4, kind: input, shape index: {}]   ;;  %s2001_s5 = inlined_call_operand.vmem [shape: bf16[8,4], index: 5, kind: input, shape index: {}]   ;;  %s2002_s6 = inlined_call_operand.vmem [shape: f32[8,1], index: 6, kind: input, shape index: {}]   ;;  %s2003_s7 = inlined_call_operand.vmem [shape: bf16[8,24], index: 7, kind: input, shape index: {}]   ;;  %s2004_s8 = inlined_call_operand.vmem [shape: f32[8,1], index: 8, kind: input, shape index: {}]   ;;  %s2005_s9 = inlined_call_operand.vmem [shape: bf16[8,24], index: 9, kind: input, shape index: {}]   ;;  %s2006_s10 = inlined_call_operand.vmem [shape: f32[8,1], index: 10, kind: input, shape index: {}]   ;;  %s2007_s11 = inlined_call_operand.vmem [shape: bf16[16,24], index: 11, kind: input, shape index: {}]   ;;  %s2008_s12 = inlined_call_operand.vmem [shape: f32[16,1], index: 12, kind: input, shape index: {}]   ;;  %s2009_s13 = inlined_call_operand.vmem [shape: bf16[16,48], index: 13, kind: input, shape index: {}]   ;;  %s2010_s14 = inlined_call_operand.vmem [shape: f32[16,1], index: 14, kind: input, shape index: {}]   ;;  %s2011_s15 = inlined_call_operand.vmem [shape: bf16[16,8], index: 15, kind: input, shape index: {}]   ;;  %s2012_s16 = inlined_call_operand.vmem [shape: f32[16,1], index: 16, kind: input, shape index: {}]   ;;  %s2013_s17 = inlined_call_operand.hbm [shape: f32[2,16,128], index: 17, kind: output, shape index: {}]  }
   0x1   :  { %2017 = sst [smem:[#allocation13_spill]] %s1996_s0 }
   0x2   :  { %2018 = sst [smem:[#allocation14_spill]] %s1997_s1 }
   0x3   :  { %2019 = sst [smem:[#allocation15_spill]] %s1998_s2 }
   0x4   :  { %2020 = sst [smem:[#allocation16_spill]] %s1999_s3 }
   0x5   :  { %2021 = sst [smem:[#allocation17_spill]] %s2000_s4 }
   0x6   :  { %2022 = sst [smem:[#allocation18_spill]] %s2001_s5 }
   0x7   :  { %22 = vsyncpa [#allocation9], 0 }
   0x8   :  { %24 = vsyncpa [#allocation9 + $0x1], 0  ;;  %s1700_s24 = smov 0   ;;  %s1702_s25 = smov 0  }
   0x9   :  { %s1704_s26 = smov 0   ;;  %s1706_s27 = smov 0  }
   0xa   :  { %s1708_s28 = smov 0   ;;  %s1710_s29 = smov 0  }
   0xb LB: > { %2023 = sst [smem:[#allocation11_spill]] %s1592_s28  ;;  %s1339_s0 = sadd.s32 4294967295, %s1596_s29   ;;  %s1596_s29 = sphi %s1710_s29, %s30_s29   ;;  %s1592_s28 = sphi %s1708_s28, %s2035_s28   ;;  %s1588_s27 = sphi %s1706_s27, %s2034_s27   ;;  %s1584_s26 = sphi %s1704_s26, %s2038_s26   ;;  %s1580_s25 = sphi %s1702_s25, %s2037_s25   ;;  %s1576_s24 = sphi %s1700_s24, %s2036_s24  }
   0xc   : > { %s1340_s30 = sadd.s32 4294967294, %s1596_s29   ;;  %s42_s18 = sadd.s32 1, %s1592_s28 }
   0xd   : > { %s415_s19 = sadd.s32 1, %s1584_s26  ;;  %p44_p0 = scmp.ge.s32.totalorder %s42_s18, 2 }
   0xe   : > { %p425_p1 = scmp.ne.s32.totalorder %s1584_s26, %s1580_s25  ;;  %p426_p2 = scmp.eq.s32.totalorder %s1339_s0, 1 }
   0xf   : > { %p431_p3 = scmp.ne.s32.totalorder %s1580_s25, %s1576_s24  ;;  %s2040_s18 = smov (%p44_p0, %s42_s18), 0 }
  0x10   : > { %2024 = sst [smem:[#allocation12_spill]] %s2040_s18  ;;  %p1740_p4 = por %p426_p2, %p425_p1 }
  0x11   : > { %p432_p5 = scmp.eq.s32.totalorder %s1340_s30, 1  ;;  %s410_s20 = ssub.s32 %s1592_s28, %s2040_s18 }
  0x12   : > { %p1343_p6 = scmp.ge.s32.totalorder %s1596_s29, 1  ;;  %p413_p7 = scmp.eq.s32.totalorder %s410_s20, 0 }
  0x13   : > { %p1747_p8 = por %p432_p5, %p431_p3  ;;  %p508_p9 = scmp.lt.s32.totalorder %s1596_s29, 3 }
  0x14   : > { %s1753_s22 = scalar_select %p413_p7, %s1584_s26, %s415_s19  }
  0x15   : > { %p509_p10 = pnand %p1343_p6, %p508_p9 }
  0x16   : > { %p562_p11 = scmp.lt.s32.totalorder (!%p509_p10), %s1588_s27, 1  ;;  %s2027_s19 = sld [smem:[#allocation13_spill]] (!%p509_p10) }
  0x17   : > { %512 = sbr.rel (%p509_p10) target bundleno = 2707 (0xa93), region = 88  ;;  %s1599_s28 = smov (!%p509_p10), 2  }
  0x18   : > { %s2028_s2 = sld [smem:[#allocation15_spill]] (!%p509_p10)  ;;  %s1607_s20 = smov (!%p509_p10), 120  }
  0x19   : > { %s2030_s5 = sld [smem:[#allocation18_spill]] (!%p509_p10) }
  0x1a   : > { %s2031_s4 = sld [smem:[#allocation17_spill]] (!%p509_p10) }
  0x1b   : > { %s2032_s3 = sld [smem:[#allocation16_spill]] (!%p509_p10) }
  0x1c   : > { %vm574_vm0 = vcmask 9216   ;;  %v1598_v0 = vmov 0   ;;  %s563_s23 = scalar_select %p562_p11, %s1588_s27, 1  ;;  %v1600_v3 = vmov 0.0   ;;  %vm592_vm1 = vcmask 15360   ;;  %v759_v37 = vld [vmem:[%s2002_s6] sm:$0xff] }
  0x1d   : > { %575 = vst.msk [vmem:[#allocation2] sm:$0x3] %vm574_vm0, %v1598_v0  ;;  %1514 = vset.pattern.permute.xlu1 %v1598_v0  ;;  %1515 = vset.pattern.permute.xlu0 %v1598_v0  ;;  %vm1601_vm2 = vmmov 0   ;;  %vm605_vm3 = vcmask 1039360   ;;  %vm613_vm4 = vcmask 1031168   ;;  %vm615_vm5 = vcmask 1041408  }
  0x1e   : > { %s1345_s0 = sshll.u32 %s563_s23, 2  ;;  %1388 = vmatprep.subr.bf16.mxu0 %v1600_v3  ;;  %1394 = vmatprep.subr.bf16.mxu1 %v1600_v3  ;;  %s1603_s23 = smov 126   ;;  %v622_v11 = vld [vmem:[%s2028_s2] sm:$0xff]  ;;  %vm618_vm6 = vcmask 1043456   ;;  %vm632_vm7 = vcmask 1045504   ;;  %vm628_vm8 = vcmask 97280  }
  0x1f   : > { %s568_s18 = scalar_lea.vmem %s2027_s19, %s1345_s0  ;;  %1390 = vmatprep.mubr.msk.bf16.mxu0 %vm1601_vm2, %v1600_v3  ;;  %1398 = vmatprep.mubr.msk.bf16.mxu1 %vm1601_vm2, %v1600_v3  ;;  %s2029_s0 = sld [smem:[#allocation14_spill]]  ;;  %vm576_vm9 = vcmask 11264   ;;  %v758_v31 = vld [vmem:[%s2030_s5] sm:$0xf]  ;;  %vm765_vm10 = vcmask 31744   ;;  %vm710_vm11 = vcmask 195584  }
  0x20   : > { %v585_v1 = vld [vmem:[%s568_s18] sm:$0xf]  ;;  %s1602_s18 = smov 127   ;;  %577 = vst.msk [vmem:[#allocation3] sm:$0xf] %vm576_vm9, %v1598_v0  ;;  %vm578_vm12 = vcmask 27648  }
  0x21   : > { %v586_v2 = vpack.c.bf16 %v585_v1, %v585_v1  ;;  %v704_v38 = vld [vmem:[%s2031_s4] sm:$0xff]  ;;  %579 = vst.msk [vmem:[#allocation4] sm:$0xf] %vm578_vm12, %v1598_v0  ;;  %580 = vst.msk [vmem:[#allocation5] sm:$0xf] %vm578_vm12, %v1598_v0  ;;  %s1605_s19 = smov 124  }
  0x22   : > { %v703_v47 = vld [vmem:[%s2032_s3] sm:$0xf]  ;;  %vm837_vm13 = vcmask 1014784   ;;  %vm581_vm14 = vcmask 60416   ;;  %vm984_vm15 = vcmask 64512   ;;  %s559_s3 = sand.u32 1, %s1580_s25  }
  0x23   : > { %589 = vrot.lane.b32.xlu0 %v586_v2, %s1599_s28  ;;  %v770_v30 = vsel %vm615_vm5, %v586_v2, 0  ;;  %582 = vst.msk [vmem:[#allocation6] sm:$0xf] %vm581_vm14, %v1598_v0  ;;  %583 = vst.msk [vmem:[#allocation7] sm:$0xf] %vm581_vm14, %v1598_v0  ;;  %s1950_s2 = scalar_lea.sflag [#allocation9], %s559_s3 }
  0x24   : > { %v587_v4 = vld [vmem:[#allocation2] sm:$0x3]  ;;  %584 = vst.msk [vmem:[#allocation7 + $0x4] sm:$0xf] %vm581_vm14, %v1598_v0 }
  0x25   : > { %v621_v21 = vld [vmem:[%s2029_s0] sm:$0xf] }
  0x27   : > { %v677_v32 = vld [vmem:[#allocation3] sm:$0xf] }
  0x28   : > { %v815_v1 = vld [vmem:[#allocation4] sm:$0xf] }
  0x95   : > { %v590_v5 = vpop.permute.xlu0 %589 }
  0x96   : > { %v595_v6 = vsel %vm592_vm1, %v587_v4, %v590_v5  ;;  %597 = vst.msk [vmem:[#allocation2] sm:$0x3] %vm574_vm0, %v590_v5  ;;  %v600_v7 = vrot.slane %v590_v5, 6  ;;  %v608_v10 = vrot.slane %v590_v5, 4  ;;  %vm1002_vm0 = vcmask 982016  }
  0x97   : > { %v599_v8 = vrot.slane %v595_v6, 6  ;;  %v607_v9 = vrot.slane %v595_v6, 4 }
  0x98   : > { %603 = vrot.lane.b32.xlu1 %v600_v7, %s1602_s18  ;;  %v843_v7 = vld [vmem:[%s2004_s8] sm:$0xff] }
  0x99   : > { %601 = vrot.lane.b32.xlu0 %v599_v8, %s1602_s18 }
  0x9c   : > { %609 = vrot.lane.b32.xlu1 %v607_v9, %s1603_s23 }
  0x9d   : > { %611 = vrot.lane.b32.xlu0 %v608_v10, %s1603_s23 }
  0xa0   : > { %625 = vperm.xlu1 %1514, %v622_v11  }
 0x10a   : > { %v604_v12 = vpop.permute.xlu1 %603 }
 0x10b   : > { %v602_v13 = vpop.permute.xlu0 %601 }
 0x10c   : > { %v606_v14 = vsel %vm605_vm3, %v602_v13, %v604_v12 }
 0x10d   : > { %v617_v18 = vsel %vm615_vm5, %v595_v6, %v606_v14 }
 0x10e   : > { %v610_v15 = vpop.permute.xlu1 %609 }
 0x10f   : > { %v612_v16 = vpop.permute.xlu0 %611 }
 0x110   : > { %v614_v17 = vsel %vm613_vm4, %v610_v15, %v612_v16  ;;  %v842_v16 = vld [vmem:[%s2003_s7] sm:$0xf] }
 0x111   : > { %v620_v19 = vsel %vm618_vm6, %v617_v18, %v614_v17 }
 0x112   : > { %v633_v20 = vsel %vm632_vm7, %v620_v19, 0 }
 0x113   : > { %1389 = vmatpush3.bf16.msra.mxu0 %v633_v20 }
 0x114   : > { %1402 = vmatprep.subr.bf16.mxu0 %v1600_v3 }
 0x116   : > { %1391 = vmatmul.mubr.msk.bf16.vlgmr.msra.gmra.mxu0 %vm628_vm8, %v621_v21 }
 0x117   : > { %1404 = vmatprep.mubr.msk.bf16.mxu0 %vm1601_vm2, %v1600_v3  ;;  %1403 = vmatpush3.bf16.msra.mxu0 %v770_v30  ;;  %v923_v30 = vld [vmem:[%s2006_s10] sm:$0xff] }
 0x118   : > { %1416 = vmatprep.subr.bf16.mxu0 %v1600_v3 }
 0x11b   : > { %v626_v22 = vpop.permute.xlu1 %625 }
 0x11e   : > { %1405 = vmatmul.mubr.msk.bf16.vlgmr.msra.gmra.mxu0 %vm765_vm10, %v758_v31 }
 0x11f   : > { %1420 = vmatprep.mubr.msk.bf16.mxu0 %vm1601_vm2, %v1600_v3 }
 0x1d6   : > { %v669_v23 = vpop.f32.mrf.mxu0 }
 0x1d7   : > { %v670_v24 = vadd.f32 %v669_v23, %v626_v22 }
 0x1d8   : > { %v1392_v25 = vpop.f32.mrf.mxu0 }
 0x1d9   : > { %v675_v26 = vmax.f32 %v670_v24, 0.0  ;;  %v897_v25 = vld [vmem:[#allocation5] sm:$0xf] }
 0x1da   : > { %v672_v27 = vpop.f32.mrf.mxu0 }
 0x1db   : > { %v676_v28 = vpack.c.bf16 %v675_v26, %v675_v26 }
 0x1dc   : > { %v1393_v29 = vpop.f32.mrf.mxu0 }
 0x1dd   : > { %679 = vrot.lane.b32.xlu0 %v676_v28, %s1599_s28  ;;  %s1604_s28 = smov 4  }
 0x1de   : > { %v806_v48 = vpop.f32.mrf.mxu0 }
 0x1e0   : > { %v1406_v49 = vpop.f32.mrf.mxu0 }
 0x1e2   : > { %v809_v50 = vpop.f32.mrf.mxu0 }
 0x1e3   : > { %v979_v50 = vld [vmem:[#allocation6] sm:$0xf] }
 0x1e4   : > { %v1407_v51 = vpop.f32.mrf.mxu0 }
 0x24f   : > { %v680_v33 = vpop.permute.xlu0 %679 }
 0x250   : > { %697 = vrot.lane.b32.xlu0 %v680_v33, %s1603_s23  ;;  %v684_v34 = vsel %vm592_vm1, %v677_v32, %v680_v33  ;;  %686 = vst.msk [vmem:[#allocation3] sm:$0xf] %vm576_vm9, %v680_v33  ;;  %v689_v35 = vrot.slane %v680_v33, 4  ;;  %vm1130_vm1 = vcmask 392192  }
 0x251   : > { %695 = vrot.lane.b32.xlu1 %v684_v34, %s1603_s23  ;;  %v688_v36 = vrot.slane %v684_v34, 4 }
 0x254   : > { %692 = vrot.lane.b32.xlu0 %v689_v35, %s1602_s18 }
 0x255   : > { %690 = vrot.lane.b32.xlu1 %v688_v36, %s1602_s18  ;;  %s2016_s18 = smov 8  }
 0x258   : > { %762 = vperm.xlu0 %1515, %v759_v37  }
 0x259   : > { %707 = vperm.xlu1 %1514, %v704_v38  }
 0x2c2   : > { %v698_v39 = vpop.permute.xlu0 %697 }
 0x2c3   : > { %v696_v40 = vpop.permute.xlu1 %695 }
 0x2c4   : > { %v699_v41 = vsel %vm613_vm4, %v696_v40, %v698_v39  ;;  %v922_v39 = vld [vmem:[%s2005_s9] sm:$0xf] }
 0x2c5   : > { %v715_v42 = vsel %vm618_vm6, %v699_v41, 0 }
 0x2c6   : > { %1395 = vmatpush3.bf16.msra.mxu1 %v715_v42  ;;  %v693_v43 = vpop.permute.xlu0 %692 }
 0x2c7   : > { %v691_v44 = vpop.permute.xlu1 %690  ;;  %1396 = vmatprep.subr.bf16.mxu1 %v1600_v3 }
 0x2c8   : > { %v694_v45 = vsel %vm605_vm3, %v691_v44, %v693_v43 }
 0x2c9   : > { %v701_v46 = vsel %vm618_vm6, %v684_v34, %v694_v45 }
 0x2ca   : > { %1397 = vmatpush3.bf16.msra.mxu1 %v701_v46 }
 0x2cb   : > { %1408 = vmatprep.subr.bf16.mxu1 %v1600_v3 }
 0x2cd   : > { %1399 = vmatmul.mubr.msk.bf16.vlgmr.msra.gmra.mxu1 %vm710_vm11, %v703_v47 }
 0x2ce   : > { %1412 = vmatprep.mubr.msk.bf16.mxu1 %vm1601_vm2, %v1600_v3 }
 0x2d3   : > { %v763_v52 = vpop.permute.xlu0 %762 }
 0x2d4   : > { %v708_v53 = vpop.permute.xlu1 %707  ;;  %v807_v56 = vadd.f32 %v806_v48, %v763_v52 }
 0x38d   : > { %v751_v54 = vpop.f32.mrf.mxu1 }
 0x38e   : > { %v752_v55 = vadd.f32 %v751_v54, %v708_v53  ;;  %v1010_v54 = vld [vmem:[%s2008_s12 + $0x8] sm:$0xff] }
 0x38f   : > { %v1400_v57 = vpop.f32.mrf.mxu1 }
 0x390   : > { %v757_v58 = vmax.f32 %v752_v55, 0.0  ;;  %v1009_v55 = vld [vmem:[%s2008_s12] sm:$0xff] }
 0x391   : > { %v754_v59 = vpop.f32.mrf.mxu1 }
 0x392   : > { %v812_v60 = vadd.f32 %v807_v56, %v757_v58 }
 0x393   : > { %v1401_v61 = vpop.f32.mrf.mxu1 }
 0x394   : > { %v1829_v62 = vmax.f32 %v812_v60, 0.0 }
 0x396   : > { %v814_v63 = vpack.c.bf16 %v1829_v62, %v1829_v62 }
 0x398   : > { %817 = vrot.lane.b32.xlu1 %v814_v63, %s1604_s28 }
 0x40a   : > { %v818_v2 = vpop.permute.xlu1 %817 }
 0x40b   : > { %835 = vrot.lane.b32.xlu0 %v818_v2, %s1605_s19  ;;  %v822_v4 = vsel %vm765_vm10, %v815_v1, %v818_v2  ;;  %824 = vst.msk [vmem:[#allocation4] sm:$0xf] %vm578_vm12, %v818_v2  ;;  %v827_v5 = vrot.slane %v818_v2, 4  ;;  %v1516_v1 = vld [vmem:[%s2007_s11] sm:$0xff]  }
 0x40c   : > { %833 = vrot.lane.b32.xlu1 %v822_v4, %s1605_s19  ;;  %v826_v6 = vrot.slane %v822_v4, 4 }
 0x40f   : > { %830 = vrot.lane.b32.xlu0 %v827_v5, %s1603_s23 }
 0x410   : > { %828 = vrot.lane.b32.xlu1 %v826_v6, %s1603_s23 }
 0x414   : > { %846 = vperm.xlu1 %1514, %v843_v7  }
 0x47d   : > { %v836_v8 = vpop.permute.xlu0 %835 }
 0x47e   : > { %v834_v9 = vpop.permute.xlu1 %833 }
 0x47f   : > { %v838_v10 = vsel %vm837_vm13, %v834_v9, %v836_v8 }
 0x480   : > { %v853_v11 = vsel %vm618_vm6, %v838_v10, 0 }
 0x481   : > { %1409 = vmatpush3.bf16.msra.mxu1 %v853_v11  ;;  %v831_v12 = vpop.permute.xlu0 %830 }
 0x482   : > { %v829_v13 = vpop.permute.xlu1 %828  ;;  %1410 = vmatprep.subr.bf16.mxu1 %v1600_v3 }
 0x483   : > { %v832_v14 = vsel %vm613_vm4, %v829_v13, %v831_v12 }
 0x484   : > { %v840_v15 = vsel %vm618_vm6, %v822_v4, %v832_v14  ;;  %v1517_v4 = vld [vmem:[%s2011_s15] sm:$0xff]  }
 0x485   : > { %1411 = vmatpush3.bf16.msra.mxu1 %v840_v15 }
 0x486   : > { %1424 = vmatprep.subr.bf16.mxu1 %v1600_v3 }
 0x488   : > { %1413 = vmatmul.mubr.msk.bf16.vlgmr.msra.gmra.mxu1 %vm710_vm11, %v842_v16  ;;  %v1518_v16 = vld [vmem:[#allocation7] sm:$0xff]  }
 0x489   : > { %1428 = vmatprep.mubr.msk.bf16.mxu1 %vm1601_vm2, %v1600_v3 }
 0x48f   : > { %v847_v17 = vpop.permute.xlu1 %846 }
 0x548   : > { %v889_v18 = vpop.f32.mrf.mxu1 }
 0x549   : > { %v890_v19 = vadd.f32 %v889_v18, %v847_v17 }
 0x54a   : > { %v1414_v20 = vpop.f32.mrf.mxu1 }
 0x54b   : > { %v895_v21 = vmax.f32 %v890_v19, 0.0 }
 0x54c   : > { %v892_v22 = vpop.f32.mrf.mxu1 }
 0x54d   : > { %v896_v23 = vpack.c.bf16 %v895_v21, %v895_v21  ;;  %v1114_v22 = vld [vmem:[%s2010_s14 + $0x8] sm:$0xff] }
 0x54e   : > { %v1415_v24 = vpop.f32.mrf.mxu1 }
 0x54f   : > { %899 = vrot.lane.b32.xlu0 %v896_v23, %s1604_s28  ;;  %v1113_v24 = vld [vmem:[%s2010_s14] sm:$0xff] }
 0x5c1   : > { %v900_v26 = vpop.permute.xlu0 %899 }
 0x5c2   : > { %916 = vrot.lane.b32.xlu0 %v900_v26, %s1605_s19  ;;  %v904_v27 = vsel %vm765_vm10, %v897_v25, %v900_v26  ;;  %905 = vst.msk [vmem:[#allocation5] sm:$0xf] %vm578_vm12, %v900_v26  ;;  %v908_v28 = vrot.slane %v900_v26, 4  ;;  %v1180_v26 = vld [vmem:[%s2012_s16 + $0x8] sm:$0xff] }
 0x5c3   : > { %914 = vrot.lane.b32.xlu1 %v904_v27, %s1605_s19  ;;  %v907_v29 = vrot.slane %v904_v27, 4 }
 0x5c6   : > { %911 = vrot.lane.b32.xlu0 %v908_v28, %s1603_s23  ;;  %v1179_v28 = vld [vmem:[%s2012_s16] sm:$0xff] }
 0x5c7   : > { %909 = vrot.lane.b32.xlu1 %v907_v29, %s1603_s23  ;;  %s1365_s23 = sshll.u32 %s1588_s27, 8  ;;  %s1608_s27 = smov [#allocation8]  }
 0x5c8   : > { %s1524_s4 = sshll.u32 %s1608_s27, 4  ;;  %s1525_s4 = int_to_ptr.vmem [resolvable:$false] %s1524_s4 }
 0x5c9   : > { %s1526_s5 = scalar_lea.vmem %s1525_s4, 512 }
 0x5cb   : > { %926 = vperm.xlu1 %1514, %v923_v30  }
 0x634   : > { %v917_v31 = vpop.permute.xlu0 %916 }
 0x635   : > { %v915_v32 = vpop.permute.xlu1 %914 }
 0x636   : > { %v918_v33 = vsel %vm837_vm13, %v915_v32, %v917_v31 }
 0x637   : > { %v933_v34 = vsel %vm618_vm6, %v918_v33, 0 }
 0x638   : > { %1417 = vmatpush3.bf16.msra.mxu0 %v933_v34  ;;  %v912_v35 = vpop.permute.xlu0 %911 }
 0x639   : > { %v910_v36 = vpop.permute.xlu1 %909  ;;  %1418 = vmatprep.subr.bf16.mxu0 %v1600_v3 }
 0x63a   : > { %v913_v37 = vsel %vm613_vm4, %v910_v36, %v912_v35  ;;  %v1519_v35 = vld [vmem:[%s2009_s13] sm:$0xff]  }
 0x63b   : > { %v920_v38 = vsel %vm618_vm6, %v904_v27, %v913_v37 }
 0x63c   : > { %1419 = vmatpush3.bf16.msra.mxu0 %v920_v38 }
 0x63d   : > { %1432 = vmatprep.subr.bf16.mxu0 %v1600_v3 }
 0x63f   : > { %1421 = vmatmul.mubr.msk.bf16.vlgmr.msra.gmra.mxu0 %vm710_vm11, %v922_v39 }
 0x640   : > { %1438 = vmatprep.mubr.msk.bf16.mxu0 %vm1601_vm2, %v1600_v3 }
 0x646   : > { %v927_v40 = vpop.permute.xlu1 %926 }
 0x6ff   : > { %v969_v41 = vpop.f32.mrf.mxu0 }
 0x700   : > { %v970_v42 = vadd.f32 %v969_v41, %v927_v40 }
 0x701   : > { %v1422_v43 = vpop.f32.mrf.mxu0 }
 0x702   : > { %v975_v44 = vmax.f32 %v970_v42, 0.0 }
 0x703   : > { %v972_v45 = vpop.f32.mrf.mxu0 }
 0x704   : > { %v976_v46 = vadd.f32 %v975_v44, %v1829_v62 }
 0x705   : > { %v1423_v47 = vpop.f32.mrf.mxu0 }
 0x706   : > { %v977_v48 = vmax.f32 %v976_v46, 0.0 }
 0x708   : > { %v978_v49 = vpack.c.bf16 %v977_v48, %v977_v48 }
 0x70a   : > { %981 = vrot.lane.b32.xlu0 %v978_v49, %s2016_s18  ;;  %v1200_v2 = vsel %vm618_vm6, %v978_v49, 0 }
 0x77c   : > { %v982_v51 = vpop.permute.xlu0 %981 }
 0x77d   : > { %1000 = vrot.lane.b32.xlu0 %v982_v51, %s1607_s20  ;;  %v987_v0 = vsel %vm984_vm15, %v979_v50, %v982_v51  ;;  %989 = vst.msk [vmem:[#allocation6] sm:$0xf] %vm581_vm14, %v982_v51  ;;  %v992_v52 = vrot.slane %v982_v51, 4 }
 0x77e   : > { %998 = vrot.lane.b32.xlu1 %v987_v0, %s1607_s20  ;;  %v991_v53 = vrot.slane %v987_v0, 4 }
 0x781   : > { %995 = vrot.lane.b32.xlu0 %v992_v52, %s1605_s19 }
 0x782   : > { %993 = vrot.lane.b32.xlu1 %v991_v53, %s1605_s19 }
 0x785   : > { %1018 = vperm.xlu0 %1515, %v1010_v54  }
 0x786   : > { %1013 = vperm.xlu1 %1514, %v1009_v55  }
 0x7ef   : > { %v1001_v56 = vpop.permute.xlu0 %1000 }
 0x7f0   : > { %v999_v57 = vpop.permute.xlu1 %998 }
 0x7f1   : > { %v1003_v58 = vsel %vm1002_vm0, %v999_v57, %v1001_v56 }
 0x7f2   : > { %v1030_v59 = vsel %vm618_vm6, %v1003_v58, 0 }
 0x7f3   : > { %1425 = vmatpush3.bf16.msra.mxu1 %v1030_v59  ;;  %v996_v60 = vpop.permute.xlu0 %995 }
 0x7f4   : > { %v994_v61 = vpop.permute.xlu1 %993  ;;  %1426 = vmatprep.subr.bf16.mxu1 %v1600_v3 }
 0x7f5   : > { %v997_v62 = vsel %vm837_vm13, %v994_v61, %v996_v60 }
 0x7f6   : > { %v1005_v63 = vsel %vm618_vm6, %v987_v0, %v997_v62 }
 0x7f7   : > { %1427 = vmatpush3.bf16.msra.mxu1 %v1005_v63 }
 0x7f8   : > { %1442 = vmatprep.subr.bf16.mxu1 %v1600_v3 }
 0x7fa   : > { %1429 = vmatmul.mubr.msk.bf16.vlgmr.msra.gmra.mxu1 %vm710_vm11, %v1516_v1 }
 0x7fb   : > { %1443 = vmatpush3.bf16.msra.mxu1 %v1200_v2  ;;  %1444 = vmatprep.mubr.msk.bf16.mxu1 %vm1601_vm2, %v1600_v3 }
 0x800   : > { %v1019_v9 = vpop.permute.xlu0 %1018 }
 0x801   : > { %v1014_v6 = vpop.permute.xlu1 %1013 }
 0x802   : > { %1445 = vmatmul.mubr.msk.bf16.vlgmr.msra.gmra.mxu1 %vm984_vm15, %v1517_v4 }
 0x8ba   : > { %v1066_v5 = vpop.f32.mrf.mxu1 }
 0x8bb   : > { %v1067_v8 = vadd.f32 %v1066_v5, %v1014_v6 }
 0x8bc   : > { %v1430_v7 = vpop.f32.mrf.mxu1 }
 0x8bd   : > { %v1073_v13 = vmax.f32 %v1067_v8, 0.0 }
 0x8be   : > { %v1069_v10 = vpop.f32.mrf.mxu1 }
 0x8bf   : > { %v1070_v11 = vadd.f32 %v1069_v10, %v1019_v9 }
 0x8c0   : > { %v1431_v12 = vpop.f32.mrf.mxu1 }
 0x8c1   : > { %v1074_v14 = vmax.f32 %v1070_v11, 0.0 }
 0x8c2   : > { %v1236_v21 = vpop.f32.mrf.mxu1 }
 0x8c3   : > { %v1075_v15 = vpack.c.bf16 %v1074_v14, %v1073_v13 }
 0x8c4   : > { %v1446_v23 = vpop.f32.mrf.mxu1 }
 0x8c5   : > { %1084 = vrot.lane.b32.xlu1 %v1075_v15, %s2016_s18  ;;  %s1344_s18 = sshll.u32 %s559_s3, 4 }
 0x8c6   : > { %v1239_v25 = vpop.f32.mrf.mxu1  ;;  %s561_s0 = scalar_lea.vmem [#allocation8], %s1344_s18 }
 0x8c7   : > { %s1264_s30 = sshll.u32 %s561_s0, 4  ;;  %s1943_s30 = int_to_ptr.vmem [resolvable:$true] %s1264_s30 }
 0x8c8   : > { %v1447_v27 = vpop.f32.mrf.mxu1  ;;  %s1520_s18 = scalar_lea.vmem %s1943_s30, 256  ;;  %p1527_p1 = scmp.lt.s32.totalorder %s1943_s30, %s1525_s4 }
 0x8c9   : > { %p1521_p12 = scmp.ne.s32.totalorder %s1943_s30, %s1520_s18  ;;  %p1528_p2 = scmp.lt.s32.totalorder %s1526_s5, %s1520_s18 }
 0x8cb   : > { %p1522_p13 = pnand %p1521_p12, %p1740_p4  ;;  %p1529_p3 = por %p1528_p2, %p1527_p1 }
 0x8cd   : > { %p1523_p0 = pneg %p1522_p13 }
 0x8cf   : > { %p1530_p5 = pnand %p1529_p3, %p1523_p0 }
 0x937   : > { %v1085_v17 = vpop.permute.xlu1 %1084 }
 0x938   : > { %v1354_v18 = vcombine.low %v1085_v17, %v1085_v17  ;;  %v1355_v19 = vcombine.high %v1085_v17, %v1085_v17  ;;  %1107 = vrot.lane.b32.xlu1 %v1085_v17, %s1607_s20  ;;  %v1088_v20 = vsel %vm984_vm15, %v1518_v16, %v1085_v17 }
 0x939   : > { %1105 = vrot.lane.b32.xlu0 %v1088_v20, %s1607_s20 }
 0x93a   : > { %1096 = vst.msk [vmem:[#allocation7] sm:$0xf] %vm581_vm14, %v1354_v18  ;;  %1097 = vst.msk [vmem:[#allocation7 + $0x4] sm:$0xf] %vm581_vm14, %v1355_v19 }
 0x93c   : > { %1101 = vrot.lane.b32.xlu1 %v1085_v17, %s1605_s19 }
 0x93d   : > { %1099 = vrot.lane.b32.xlu0 %v1088_v20, %s1605_s19  ;;  %s1948_s19 = scalar_lea.hbm %s2013_s17, %s1365_s23 }
 0x940   : > { %1122 = vperm.xlu1 %1514, %v1114_v22  }
 0x941   : > { %1117 = vperm.xlu0 %1515, %v1113_v24  }
 0x944   : > { %1188 = vperm.xlu1 %1514, %v1180_v26  }
 0x945   : > { %1183 = vperm.xlu0 %1515, %v1179_v28  }
 0x9aa   : > { %v1108_v29 = vpop.permute.xlu1 %1107 }
 0x9ab   : > { %v1106_v30 = vpop.permute.xlu0 %1105 }
 0x9ac   : > { %v1109_v31 = vsel %vm1002_vm0, %v1106_v30, %v1108_v29 }
 0x9ad   : > { %1433 = vmatpush3.bf16.msra.mxu0 %v1109_v31 }
 0x9ae   : > { %v1102_v32 = vpop.permute.xlu1 %1101  ;;  %1434 = vmatprep.subr.bf16.mxu0 %v1600_v3 }
 0x9af   : > { %v1100_v33 = vpop.permute.xlu0 %1099 }
 0x9b0   : > { %v1103_v34 = vsel %vm837_vm13, %v1100_v33, %v1102_v32 }
 0x9b1   : > { %1435 = vmatpush3.bf16.msra.mxu0 %v1103_v34 }
 0x9b2   : > { %1436 = vmatprep.subr.bf16.mxu0 %v1600_v3 }
 0x9b5   : > { %1437 = vmatpush3.bf16.msra.mxu0 %v1088_v20 }
 0x9b8   : > { %1439 = vmatmul.mubr.msk.bf16.vlgmr.msra.gmra.mxu0 %vm1130_vm1, %v1519_v35 }
 0x9bb   : > { %v1123_v37 = vpop.permute.xlu1 %1122 }
 0x9bc   : > { %v1118_v36 = vpop.permute.xlu0 %1117 }
 0x9bf   : > { %v1189_v44 = vpop.permute.xlu1 %1188 }
 0x9c0   : > { %v1184_v38 = vpop.permute.xlu0 %1183  ;;  %v1240_v48 = vadd.f32 %v1239_v25, %v1189_v44 }
 0x9c1   : > { %v1237_v42 = vadd.f32 %v1236_v21, %v1184_v38 }
 0xa78   : > { %v1168_v39 = vpop.f32.mrf.mxu0 }
 0xa79   : > { %v1169_v40 = vadd.f32 %v1168_v39, %v1118_v36 }
 0xa7a   : > { %v1440_v41 = vpop.f32.mrf.mxu0 }
 0xa7b   : > { %v1175_v43 = vmax.f32 %v1169_v40, 0.0 }
 0xa7c   : > { %v1171_v3 = vpop.f32.mrf.mxu0 }
 0xa7d   : > { %v1243_v45 = vadd.f32 %v1237_v42, %v1175_v43  ;;  %v1172_v46 = vadd.f32 %v1171_v3, %v1123_v37 }
 0xa7e   : > { %v1441_v47 = vpop.f32.mrf.mxu0 }
 0xa7f   : > { %v1245_v49 = vmax.f32 %v1243_v45, 0.0  ;;  %v1176_v50 = vmax.f32 %v1172_v46, 0.0 }
 0xa81   : > { %1247 = vst [vmem:[%s561_s0] sm:$0xff] %v1245_v49  ;;  %v1244_v51 = vadd.f32 %v1240_v48, %v1176_v50 }
 0xa83   : > { %v1246_v0 = vmax.f32 %v1244_v51, 0.0 }
 0xa85   : > { %1248 = vst [vmem:[%s561_s0 + $0x8] sm:$0xff] %v1246_v0 }
 0xa86   : > { %1533 = shalt.err (!%p1530_p5)
}
 0xa87   : > { %s1534_s3 = scalar_lea.hbm %s1948_s19, 256  ;;  %s1538_s28 = scalar_lea.hbm %s2013_s17, 512 }
 0xa88   : > { %p1535_p6 = scmp.ne.s32.totalorder %s1948_s19, %s1534_s3  ;;  %p1539_p10 = scmp.lt.s32.totalorder %s1948_s19, %s2013_s17 }
 0xa89   : > { %p1540_p11 = scmp.lt.s32.totalorder %s1538_s28, %s1534_s3 }
 0xa8a   : > { %p1536_p7 = pnand %p1535_p6, %p1740_p4 }
 0xa8b   : > { %p1541_p12 = por %p1540_p11, %p1539_p10 }
 0xa8c   : > { %p1537_p9 = pneg %p1536_p7 }
 0xa8e   : > { %p1542_p13 = pnand %p1541_p12, %p1537_p9 }
 0xa90   : > { %1545 = shalt.err (!%p1542_p13)
}
 0xa91   : > { %s1609_s4 = smov 128   ;;  %s2033_s5 = smov 8  }
 0xa92   : > { %1448 = dma.vmem_to_hbm [thread:$0]  (%p1740_p4), %s1943_s30, 256, %s1948_s19, %s1950_s2, %s1609_s4, %s1609_s4, %s2033_s5  }
 0xa93 PF: > { %p1454_p0 = scmp.ge.s32.totalorder %s1596_s29, 2  ;;  %s1279_s18 = sand.u32 1, %s1576_s24  }
 0xa94   : > { %s1280_s3 = scalar_lea.sflag [#allocation9], %s1279_s18 }
 0xa95   : > { %p1451_p1 = pnand %p1454_p0, %p1747_p8 }
 0xa97   : > { %p1452_p2 = pneg %p1451_p1 }
 0xa99   : > { %1571 = dma.done.wait (%p1452_p2), %s1280_s3, 256  }
 0xa9a   : > { %1573 = vsyncadd (%p1452_p2), %s1280_s3, 4294967040  ;;  %s30_s29 = sadd.s32 1, %s1596_s29   ;;  %s2034_s27 = sld [smem:[#allocation11_spill]] }
 0xa9b   : > { %p27_p3 = scmp.ge.s32.totalorder %s30_s29, 4   ;;  %s2035_s28 = sld [smem:[#allocation12_spill]] }
 0xa9c   : > { %s2036_s24 = smov %s1580_s25  ;;  %s2037_s25 = smov %s1584_s26 }
 0xa9d   : > { %s2038_s26 = smov %s1753_s22  ;;  %29 = sbr.rel (!%p27_p3) target bundleno = 11 (0xb), region = 127 }
 0xaa2   :  { %1285 = vsyncpa [#allocation9], 1 }
 0xaa3   :  { %1287 = vsyncpa [#allocation9 + $0x1], 1 }

</bundles_post_ra>
